<compile_context>
chip_gen: v7x
topology: tpu7x:2x2x1
jax: 0.10.0
libtpu: 0.0.40
codegen_flags: <defaults>
</compile_context>

<pallas_src>
import functools

import jax
import jax.numpy as jnp
from jax.experimental import pallas as pl
from jax.experimental.pallas import tpu as pltpu


def _round_up(x, m):
    return (x + m - 1) // m * m


def _vmem_limit_bytes():
    """Generation-conditional VMEM budget (review: raise on 128 MiB parts)."""
    cap = 64 * 1024 * 1024
    try:
        info = pltpu.get_tpu_info()
        cap = getattr(info, "vmem_capacity_bytes", None) or cap
    except Exception:
        pass
    # Leave headroom for Mosaic-internal scratch; ~96-100 MiB on 128 MiB parts,
    # ~48 MiB on v7x's 64 MiB.
    return min(int(cap * 3 // 4), 100 * 1024 * 1024)


# ----------------------------------------------------------------------------
# Pallas kernel: per-batch  Conv2d (s=1, p=0) + InstanceNorm2d + ReLU
# ----------------------------------------------------------------------------
def _conv_down_kernel(w_ref, mask_ref, x_ref, o_ref, rhs_ref, *,
                      K, W, inv_count, eps):
    """Fused conv + instance-norm + ReLU for one batch element.

    w_ref:   (C_out, K*K*C_in)  bf16  fused weight (tap-major, channel-minor)
    mask_ref:(1, L_pad)         f32   1.0 on valid output columns, else 0.0
    x_ref:   (C_in, HW_pad)     bf16  input, spatially flattened
    o_ref:   (C_out, L_pad)     f32   output, flattened over (H_out, W) + pad
    rhs_ref: (K*K*C_in, L_pad)  bf16  VMEM scratch for the fused conv RHS
    """
    c_in, hw_pad = x_ref.shape
    c_out, l_pad = o_ref.shape

    # --- Assemble the fused RHS: one shifted view of x per kernel tap. -------
    # Output flat index j encodes (oh, ow) = (j // W, j % W); tap (kh, kw)
    # needs input flat offset j + kh*W + kw.  For every *valid* j (j < L and
    # ow < W_out) that offset is < H*W, so the zero-filled tails below only
    # ever feed masked junk / pad columns (kept finite so mask*NaN never
    # appears in the statistics).
    rhs_ref[...] = jnp.zeros_like(rhs_ref)
    x = x_ref[...]                                   # (C_in, HW_pad) bf16
    for kh in range(K):
        for kw in range(K):
            off = kh * W + kw                        # static offset
            t = kh * K + kw
            n_cols = min(hw_pad - off, l_pad)
            rhs_ref[t * c_in:(t + 1) * c_in, 0:n_cols] = x[:, off:off + n_cols]

    # --- One fat GEMM: contraction K*K*C_in, f32 accumulation on the MXU. ----
    acc = jnp.dot(w_ref[...], rhs_ref[...],
                  preferred_element_type=jnp.float32)   # (C_out, L_pad) f32

    # --- InstanceNorm2d (per-channel stats over valid positions) + ReLU. -----
    # One-pass stats: masked sum and sum-of-squares, var = E[x^2] - mean^2.
    mask = mask_ref[...]                              # (1, L_pad) f32, 0/1
    acc_m = acc * mask
    s1 = jnp.sum(acc_m, axis=-1, keepdims=True)
    s2 = jnp.sum(acc_m * acc, axis=-1, keepdims=True)
    mean = s1 * inv_count
    var = jnp.maximum(s2 * inv_count - mean * mean, 0.0)
    y = (acc - mean) * jax.lax.rsqrt(var + eps)

    # ReLU; the same mask multiply zeroes the junk / pad columns.
    o_ref[...] = (jnp.maximum(y, 0.0) * mask).astype(o_ref.dtype)


def conv_down_forward(x, weight, *, eps=1e-5):
    """Pallas implementation of conv_down.forward (Norm=True, Dropout=0).

    x:      (N, C_in, H, W)       float32
    weight: (C_out, C_in, K, K)   PyTorch Conv2d layout, C_out = 2*C_in
    returns (N, C_out, H-K+1, W-K+1) float32
    """
    n, c_in, h, w = x.shape
    c_out, c_in_w, k, _ = weight.shape
    assert c_in == c_in_w, (c_in, c_in_w)
    assert k <= h and k <= w, (k, h, w)
    h_out, w_out = h - k + 1, w - k + 1

    # "Wide" flattened output layout: row-major over (H_out, W); columns with
    # ow >= W_out are row-wrap junk.  Lane axis padded to a multiple of 128
    # for lane-dense (unmasked) stores.
    l = h_out * w
    l_pad = _round_up(l, 128)

    # Flattened input in bf16.  No widening/im2col pad: pad only up to a lane
    # multiple (a no-op when H*W is already a multiple of 128, as in the test).
    hw = h * w
    hw_pad = _round_up(hw, 128)
    assert l_pad <= hw_pad
    x_flat = x.reshape(n, c_in, hw).astype(jnp.bfloat16)
    if hw_pad != hw:
        x_flat = jnp.pad(x_flat, ((0, 0), (0, 0), (0, hw_pad - hw)))

    # Fused weight: (C_out, K*K*C_in), contraction order (kh, kw, c_in) to
    # match the RHS assembly in the kernel.  bf16 for the MXU.
    w_fused = jnp.transpose(weight, (0, 2, 3, 1)).reshape(c_out, k * k * c_in)
    w_fused = w_fused.astype(jnp.bfloat16)

    # Precomputed validity mask (valid: j < L and (j % W) < W_out) — keeps
    # integer div/mod out of the kernel.
    col = jnp.arange(l_pad, dtype=jnp.int32)
    valid = (col < l) & ((col % w) < w_out)
    mask = valid.astype(jnp.float32)[None, :]          # (1, L_pad)

    kernel = functools.partial(
        _conv_down_kernel, K=k, W=w,
        inv_count=1.0 / float(h_out * w_out), eps=float(eps))

    out = pl.pallas_call(
        kernel,
        out_shape=jax.ShapeDtypeStruct((n, c_out, l_pad), jnp.float32),
        grid_spec=pltpu.PrefetchScalarGridSpec(
            num_scalar_prefetch=0,
            grid=(n,),
            in_specs=[
                # Fused weight (shared across the grid: constant block index).
                pl.BlockSpec((c_out, k * k * c_in), lambda b: (0, 0)),
                # Validity mask (shared).
                pl.BlockSpec((1, l_pad), lambda b: (0, 0)),
                # Per-batch flattened input (leading batch dim squeezed).
                pl.BlockSpec((pl.Squeezed(), c_in, hw_pad),
                             lambda b: (b, 0, 0)),
            ],
            out_specs=pl.BlockSpec((pl.Squeezed(), c_out, l_pad),
                                   lambda b: (b, 0, 0)),
            scratch_shapes=[pltpu.VMEM((k * k * c_in, l_pad), jnp.bfloat16)],
        ),
        compiler_params=pltpu.CompilerParams(
            dimension_semantics=("parallel",),       # batch axis -> megacore
            vmem_limit_bytes=_vmem_limit_bytes(),    # generation-conditional
        ),
    )(w_fused, mask, x_flat)

    # Drop lane padding and row-wrap junk columns to return the module's
    # (N, C_out, H_out, W_out) layout.  (A fused consumer could instead take
    # the padded (C_out, L_pad) slab and skip this copy.)
    out = out[:, :, :l].reshape(n, c_out, h_out, w)[:, :, :, :w_out]
    return out


# ----------------------------------------------------------------------------
# Pure-JAX f32 reference (straight from the Conv2d definition), independent of
# the flattened-shift rewrite used in the kernel.
# ----------------------------------------------------------------------------
def conv_down_reference(x, weight, *, eps=1e-5):
    n, c_in, h, w = x.shape
    c_out, _, k, _ = weight.shape
    h_out, w_out = h - k + 1, w - k + 1
    out = jnp.zeros((n, c_out, h_out, w_out), jnp.float32)
    for kh in range(k):
        for kw in range(k):
            out = out + jnp.einsum(
                'nihw,oi->nohw',
                x[:, :, kh:kh + h_out, kw:kw + w_out],
                weight[:, :, kh, kw])
    mean = jnp.mean(out, axis=(2, 3), keepdims=True)
    var = jnp.mean((out - mean) ** 2, axis=(2, 3), keepdims=True)
    return jnp.maximum((out - mean) * jax.lax.rsqrt(var + eps), 0.0)


if __name__ == "__main__":
    key = jax.random.PRNGKey(0)
    k_x, k_w = jax.random.split(key, 2)

    # conv_down doubles channels: channel_input=4 -> channel_output=8.
    C_IN, K = 4, 3
    C_OUT = 2 * C_IN
    x = jax.random.normal(k_x, (2, C_IN, 16, 16), dtype=jnp.float32)
    # Conv2d weight, PyTorch layout (out_channels, in_channels, kH, kW).
    weight = jax.random.normal(k_w, (C_OUT, C_IN, K, K), dtype=jnp.float32) * 0.1

    out = conv_down_forward(x, weight)
    out = jax.block_until_ready(out)

    ref = conv_down_reference(x, weight)
    assert out.shape == (2, C_OUT, 14, 14), out.shape
    # bf16 inputs to the MXU (f32 accumulation / norm math) -> relaxed tol vs
    # the pure-f32 reference.
    assert jnp.allclose(out, ref, atol=5e-2, rtol=5e-2), \
        float(jnp.max(jnp.abs(out - ref)))

    print("KERNEL_OK")
</pallas_src>

<mosaic_0001>
module attributes {stable_mosaic.version = 11 : i64} {
  func.func @_conv_down_kernel(%arg0: i32, %arg1: memref<8x36xbf16, #tpu.memory_space<vmem>>, %arg2: memref<1x256xf32, #tpu.memory_space<vmem>>, %arg3: memref<1x4x256xbf16, #tpu.memory_space<vmem>>, %arg4: memref<1x8x256xf32, #tpu.memory_space<vmem>>, %arg5: memref<36x256xbf16, #tpu.memory_space<vmem>>) attributes {dimension_semantics = [#tpu.dimension_semantics<parallel>], iteration_bounds = array<i64: 2>, scalar_prefetch = 0 : i64, scratch_operands = 1 : i64, tpu.core_type = #tpu.core_type<tc>, window_params = [{pipeline_mode = #tpu.pipeline_mode<synchronous>, transform_indices = @transform_0, window_bounds = array<i64: 8, 36>}, {pipeline_mode = #tpu.pipeline_mode<synchronous>, transform_indices = @transform_1, window_bounds = array<i64: 1, 256>}, {transform_indices = @transform_2, window_bounds = array<i64: 1, 4, 256>}, {transform_indices = @transform_3, window_bounds = array<i64: 1, 8, 256>}]} {
    %cst = arith.constant 0.000000e+00 : bf16
    %0 = vector.broadcast %cst : bf16 to vector<36x256xbf16>
    %c0 = arith.constant 0 : index
    %c0_0 = arith.constant 0 : index
    %1 = vector.load %arg5[%c0, %c0_0] : memref<36x256xbf16, #tpu.memory_space<vmem>>, vector<36x256xbf16>
    tpu.vector_store %arg5[%c0, %c0_0], %0 {strides = array<i32>} : memref<36x256xbf16, #tpu.memory_space<vmem>>, vector<36x256xbf16>,
    %c0_1 = arith.constant 0 : index
    %c0_2 = arith.constant 0 : index
    %c0_3 = arith.constant 0 : index
    %2 = vector.load %arg3[%c0_1, %c0_2, %c0_3] : memref<1x4x256xbf16, #tpu.memory_space<vmem>>, vector<1x4x256xbf16>
    %3 = vector.shape_cast %2 : vector<1x4x256xbf16> to vector<4x256xbf16>
    %c0_4 = arith.constant 0 : index
    %c0_5 = arith.constant 0 : index
    %4 = vector.load %arg5[%c0_4, %c0_5] : memref<36x256xbf16, #tpu.memory_space<vmem>>, vector<4x256xbf16>
    tpu.vector_store %arg5[%c0_4, %c0_5], %3 {strides = array<i32>} : memref<36x256xbf16, #tpu.memory_space<vmem>>, vector<4x256xbf16>,
    %5 = vector.extract_strided_slice %3 {offsets = [0, 1], sizes = [4, 255], strides = [1, 1]} : vector<4x256xbf16> to vector<4x255xbf16>
    %c4 = arith.constant 4 : index
    %c0_6 = arith.constant 0 : index
    %6 = vector.load %arg5[%c4, %c0_6] : memref<36x256xbf16, #tpu.memory_space<vmem>>, vector<4x255xbf16>
    tpu.vector_store %arg5[%c4, %c0_6], %5 {strides = array<i32>} : memref<36x256xbf16, #tpu.memory_space<vmem>>, vector<4x255xbf16>,
    %7 = vector.extract_strided_slice %3 {offsets = [0, 2], sizes = [4, 254], strides = [1, 1]} : vector<4x256xbf16> to vector<4x254xbf16>
    %c8 = arith.constant 8 : index
    %c0_7 = arith.constant 0 : index
    %8 = vector.load %arg5[%c8, %c0_7] : memref<36x256xbf16, #tpu.memory_space<vmem>>, vector<4x254xbf16>
    tpu.vector_store %arg5[%c8, %c0_7], %7 {strides = array<i32>} : memref<36x256xbf16, #tpu.memory_space<vmem>>, vector<4x254xbf16>,
    %9 = vector.extract_strided_slice %3 {offsets = [0, 16], sizes = [4, 240], strides = [1, 1]} : vector<4x256xbf16> to vector<4x240xbf16>
    %c12 = arith.constant 12 : index
    %c0_8 = arith.constant 0 : index
    %10 = vector.load %arg5[%c12, %c0_8] : memref<36x256xbf16, #tpu.memory_space<vmem>>, vector<4x240xbf16>
    tpu.vector_store %arg5[%c12, %c0_8], %9 {strides = array<i32>} : memref<36x256xbf16, #tpu.memory_space<vmem>>, vector<4x240xbf16>,
    %11 = vector.extract_strided_slice %3 {offsets = [0, 17], sizes = [4, 239], strides = [1, 1]} : vector<4x256xbf16> to vector<4x239xbf16>
    %c16 = arith.constant 16 : index
    %c0_9 = arith.constant 0 : index
    %12 = vector.load %arg5[%c16, %c0_9] : memref<36x256xbf16, #tpu.memory_space<vmem>>, vector<4x239xbf16>
    tpu.vector_store %arg5[%c16, %c0_9], %11 {strides = array<i32>} : memref<36x256xbf16, #tpu.memory_space<vmem>>, vector<4x239xbf16>,
    %13 = vector.extract_strided_slice %3 {offsets = [0, 18], sizes = [4, 238], strides = [1, 1]} : vector<4x256xbf16> to vector<4x238xbf16>
    %c20 = arith.constant 20 : index
    %c0_10 = arith.constant 0 : index
    %14 = vector.load %arg5[%c20, %c0_10] : memref<36x256xbf16, #tpu.memory_space<vmem>>, vector<4x238xbf16>
    tpu.vector_store %arg5[%c20, %c0_10], %13 {strides = array<i32>} : memref<36x256xbf16, #tpu.memory_space<vmem>>, vector<4x238xbf16>,
    %15 = vector.extract_strided_slice %3 {offsets = [0, 32], sizes = [4, 224], strides = [1, 1]} : vector<4x256xbf16> to vector<4x224xbf16>
    %c24 = arith.constant 24 : index
    %c0_11 = arith.constant 0 : index
    %16 = vector.load %arg5[%c24, %c0_11] : memref<36x256xbf16, #tpu.memory_space<vmem>>, vector<4x224xbf16>
    tpu.vector_store %arg5[%c24, %c0_11], %15 {strides = array<i32>} : memref<36x256xbf16, #tpu.memory_space<vmem>>, vector<4x224xbf16>,
    %17 = vector.extract_strided_slice %3 {offsets = [0, 33], sizes = [4, 223], strides = [1, 1]} : vector<4x256xbf16> to vector<4x223xbf16>
    %c28 = arith.constant 28 : index
    %c0_12 = arith.constant 0 : index
    %18 = vector.load %arg5[%c28, %c0_12] : memref<36x256xbf16, #tpu.memory_space<vmem>>, vector<4x223xbf16>
    tpu.vector_store %arg5[%c28, %c0_12], %17 {strides = array<i32>} : memref<36x256xbf16, #tpu.memory_space<vmem>>, vector<4x223xbf16>,
    %19 = vector.extract_strided_slice %3 {offsets = [0, 34], sizes = [4, 222], strides = [1, 1]} : vector<4x256xbf16> to vector<4x222xbf16>
    %c32 = arith.constant 32 : index
    %c0_13 = arith.constant 0 : index
    %20 = vector.load %arg5[%c32, %c0_13] : memref<36x256xbf16, #tpu.memory_space<vmem>>, vector<4x222xbf16>
    tpu.vector_store %arg5[%c32, %c0_13], %19 {strides = array<i32>} : memref<36x256xbf16, #tpu.memory_space<vmem>>, vector<4x222xbf16>,
    %c0_14 = arith.constant 0 : index
    %c0_15 = arith.constant 0 : index
    %21 = vector.load %arg1[%c0_14, %c0_15] : memref<8x36xbf16, #tpu.memory_space<vmem>>, vector<8x36xbf16>
    %c0_16 = arith.constant 0 : index
    %c0_17 = arith.constant 0 : index
    %22 = vector.load %arg5[%c0_16, %c0_17] : memref<36x256xbf16, #tpu.memory_space<vmem>>, vector<36x256xbf16>
    %cst_18 = arith.constant dense<0.000000e+00> : vector<8x256xf32>
    %23 = tpu.matmul %21, %22, %cst_18 {dimension_numbers = #tpu.dot_dimension_numbers<[1], [0], [0], [1], [0, 0, 1, 1], [], []>} : vector<8x36xbf16>, vector<36x256xbf16>, vector<8x256xf32> -> vector<8x256xf32>
    %c0_19 = arith.constant 0 : index
    %c0_20 = arith.constant 0 : index
    %24 = vector.load %arg2[%c0_19, %c0_20] : memref<1x256xf32, #tpu.memory_space<vmem>>, vector<1x256xf32>
    %25 = vector.broadcast %24 : vector<1x256xf32> to vector<8x256xf32>
    %26 = arith.mulf %23, %25 : vector<8x256xf32>
    %cst_21 = arith.constant dense<0.000000e+00> : vector<8xf32>
    %27 = vector.multi_reduction <add>, %26, %cst_21 [1] : vector<8x256xf32> to vector<8xf32>
    %28 = vector.shape_cast %27 : vector<8xf32> to vector<8x1xf32>
    %29 = arith.mulf %26, %23 : vector<8x256xf32>
    %cst_22 = arith.constant dense<0.000000e+00> : vector<8xf32>
    %30 = vector.multi_reduction <add>, %29, %cst_22 [1] : vector<8x256xf32> to vector<8xf32>
    %31 = vector.shape_cast %30 : vector<8xf32> to vector<8x1xf32>
    %cst_23 = arith.constant 0.00510204071 : f32
    %32 = vector.broadcast %cst_23 : f32 to vector<8x1xf32>
    %33 = arith.mulf %28, %32 : vector<8x1xf32>
    %cst_24 = arith.constant 0.00510204071 : f32
    %34 = vector.broadcast %cst_24 : f32 to vector<8x1xf32>
    %35 = arith.mulf %31, %34 : vector<8x1xf32>
    %36 = arith.mulf %33, %33 : vector<8x1xf32>
    %37 = arith.subf %35, %36 : vector<8x1xf32>
    %cst_25 = arith.constant 0.000000e+00 : f32
    %38 = vector.broadcast %cst_25 : f32 to vector<8x1xf32>
    %39 = arith.maximumf %37, %38 : vector<8x1xf32>
    %40 = vector.broadcast %33 : vector<8x1xf32> to vector<8x256xf32>
    %41 = arith.subf %23, %40 : vector<8x256xf32>
    %cst_26 = arith.constant 9.99999974E-6 : f32
    %42 = vector.broadcast %cst_26 : f32 to vector<8x1xf32>
    %43 = arith.addf %39, %42 : vector<8x1xf32>
    %44 = math.rsqrt %43 : vector<8x1xf32>
    %45 = vector.broadcast %44 : vector<8x1xf32> to vector<8x256xf32>
    %46 = arith.mulf %41, %45 : vector<8x256xf32>
    %cst_27 = arith.constant 0.000000e+00 : f32
    %47 = vector.broadcast %cst_27 : f32 to vector<8x256xf32>
    %48 = arith.maximumf %46, %47 : vector<8x256xf32>
    %49 = vector.broadcast %24 : vector<1x256xf32> to vector<8x256xf32>
    %50 = arith.mulf %48, %49 : vector<8x256xf32>
    %c0_28 = arith.constant 0 : index
    %c0_29 = arith.constant 0 : index
    %c0_30 = arith.constant 0 : index
    %51 = vector.load %arg4[%c0_28, %c0_29, %c0_30] : memref<1x8x256xf32, #tpu.memory_space<vmem>>, vector<1x8x256xf32>
    %52 = vector.shape_cast %51 : vector<1x8x256xf32> to vector<8x256xf32>
    %53 = vector.shape_cast %50 : vector<8x256xf32> to vector<1x8x256xf32>
    tpu.vector_store %arg4[%c0_28, %c0_29, %c0_30], %53 {strides = array<i32>} : memref<1x8x256xf32, #tpu.memory_space<vmem>>, vector<1x8x256xf32>,
    return
  }
  func.func @transform_0(%arg0: i32) -> (i32, i32) {
    %c0_i32 = arith.constant 0 : i32
    %c0_i32_0 = arith.constant 0 : i32
    %c0_i32_1 = arith.constant 0 : i32
    return %c0_i32, %c0_i32_0 : i32, i32
  }
  func.func @transform_1(%arg0: i32) -> (i32, i32) {
    %c0_i32 = arith.constant 0 : i32
    %c0_i32_0 = arith.constant 0 : i32
    %c0_i32_1 = arith.constant 0 : i32
    return %c0_i32, %c0_i32_0 : i32, i32
  }
  func.func @transform_2(%arg0: i32) -> (i32, i32, i32) {
    %c0_i32 = arith.constant 0 : i32
    %c0_i32_0 = arith.constant 0 : i32
    %c0_i32_1 = arith.constant 0 : i32
    return %arg0, %c0_i32, %c0_i32_0 : i32, i32, i32
  }
  func.func @transform_3(%arg0: i32) -> (i32, i32, i32) {
    %c0_i32 = arith.constant 0 : i32
    %c0_i32_0 = arith.constant 0 : i32
    %c0_i32_1 = arith.constant 0 : i32
    return %arg0, %c0_i32, %c0_i32_0 : i32, i32, i32
  }
}

</mosaic_0001>

<bundles_post_ra>
// kernel: tpu_custom_call.1
= control target key start
LH: loop header
LB: loop body
LE: loop exit
PB: predicated region body
PF: predicated region fallthrough
CT: control target
= control target key end

     0   :  { %8 = vsyncpa [#allocation4], 0  ;;  %s1005_s0 = inlined_call_operand.hbm [shape: bf16[8,36], index: 0, kind: input, shape index: {}]   ;;  %s1006_s1 = inlined_call_operand.vmem [shape: f32[1,256], index: 1, kind: input, shape index: {}]   ;;  %s1007_s2 = inlined_call_operand.hbm [shape: bf16[2,4,256], index: 2, kind: input, shape index: {}]   ;;  %s1008_s3 = inlined_call_operand.hbm [shape: f32[2,8,256], index: 3, kind: output, shape index: {}]  }
   0x1   :  { %9 = vsyncpa [#allocation7], 0 }
   0x2   :  { %11 = vsyncpa [#allocation7 + $0x1], 0 }
   0x3   :  { %12 = vsyncpa [#allocation5], 0 }
   0x4   :  { %14 = vsyncpa [#allocation5 + $0x1], 0  ;;  %s785_s12 = smov 0   ;;  %s787_s13 = smov 0  }
   0x5   :  { %s789_s14 = smov 0   ;;  %s791_s15 = smov 0  }
   0x6 LB: > { %s806_s16 = sadd.s32 4294967295, %s750_s15   ;;  %s517_s17 = sadd.s32 4294967294, %s750_s15   ;;  %s750_s15 = sphi %s791_s15, %s1032_s15   ;;  %s746_s14 = sphi %s789_s14, %s1031_s14   ;;  %s742_s13 = sphi %s787_s13, %s1030_s13   ;;  %s738_s12 = sphi %s785_s12, %s1029_s12  }
   0x7   : > { %p82_p0 = scmp.ne.s32.totalorder %s742_s13, %s738_s12  ;;  %p1009_p1 = scmp.eq.s32.totalorder %s806_s16, 0 }
   0x8   : > { %p112_p3 = scmp.eq.s32.totalorder %s517_s17, 1  ;;  %p518_p5 = scmp.ge.s32.totalorder %s750_s15, 1 }
   0x9   : > { %p815_p4 = por %p1009_p1, %p82_p0  ;;  %p119_p7 = scmp.lt.s32.totalorder %s750_s15, 3 }
   0xa   : > { %p820_p6 = por %p112_p3, %p82_p0  ;;  %s752_s21 = smov [#allocation3]  }
   0xb   : > { %s1012_s18 = scalar_select %p815_p4, 1, 0 }
   0xc   : > { %s1013_s19 = scalar_select %p820_p6, 1, 0 }
   0xd   : > { %p825_p8 = pnand %p518_p5, %p119_p7  ;;  %s132_s22 = sshll.u32 %s752_s21, 4  ;;  %s133_s22 = int_to_ptr.vmem [resolvable:$true] %s132_s22 }
   0xe   : > { %s833_s23 = sadd.s32 1, %s750_s15   ;;  %s69_s27 = sadd.s32 1, %s746_s14 }
   0xf   : > { %s1014_s20 = scalar_select %p825_p8, 1, 0 }
  0x10   : > { %p552_p10 = pneg %p825_p8  ;;  %s66_s25 = ssub.s32 %s750_s15, %s833_s23 }
  0x11   : > { %p843_p12 = scmp.eq.s32.totalorder %s66_s25, 0  ;;  %s622_s30 = scalar_lea.hbm %s1005_s0, 64 }
  0x12   : > { %p837_p11 = pnand %p552_p10, %p1009_p1  ;;  %p623_p0 = scmp.ne.s32.totalorder %s1005_s0, %s622_s30 }
  0x13   : > { %s1016_s26 = scalar_select %p843_p12, 1, 0 }
  0x14   : > { %p624_p3 = pneg %p837_p11  ;;  %p629_p10 = scmp.lt.u32.totalorder %s622_s30, %s1005_s0 }
  0x16   : > { %p625_p5 = pnand %p624_p3, %p623_p0 }
  0x18   : > { %p626_p7 = pneg %p625_p5 }
  0x1a   : > { %p631_p9 = pnand %p629_p10, %p626_p7 }
  0x1c   : > { %634 = shalt.err (!%p631_p9)
}
  0x1d   : > { %s635_s8 = scalar_lea.vmem %s133_s22, 64  ;;  %p643_p6 = scmp.lt.s32.totalorder %s133_s22, %s133_s22 }
  0x1e   : > { %p636_p1 = scmp.ne.s32.totalorder %s133_s22, %s635_s8  ;;  %p644_p4 = scmp.lt.s32.totalorder %s635_s8, %s635_s8 }
  0x20   : > { %p638_p2 = pnand %p636_p1, %p624_p3  ;;  %p645_p8 = por %p644_p4, %p643_p6 }
  0x22   : > { %p639_p13 = pneg %p638_p2 }
  0x24   : > { %p646_p12 = pnand %p645_p8, %p639_p13 }
  0x26   : > { %649 = shalt.err (!%p646_p12)
}
  0x27   : > { %555 = dma.hbm_to_vmem [thread:$0]  (!%p837_p11), %s1005_s0, 64, %s133_s22, [#allocation4]  }
  0x28   : > { %p1017_p1 = scmp.ne.s32.totalorder %s1016_s26, 0  ;;  %p77_p2 = scmp.eq.s32.totalorder %s750_s15, 0 }
  0x29   : > { %p1018_p4 = scmp.ne.s32.totalorder %s746_s14, %s742_s13  ;;  %p1019_p6 = scmp.eq.s32.totalorder %s806_s16, 1 }
  0x2a   : > { %s869_s11 = scalar_select %p1017_p1, %s746_s14, %s69_s27  }
  0x2b   : > { %p877_p8 = por %p1019_p6, %p1018_p4  ;;  %p565_p9 = scmp.lt.s32.totalorder %s750_s15, 2 }
  0x2c   : > { %s146_s21 = sand.u32 1, %s746_s14   ;;  %p1021_p12 = pmov %p1018_p4 }
  0x2d   : > { %s521_s24 = sshll.u32 %s146_s21, 2  ;;  %s542_s25 = sshll.u32 %s750_s15, 6 }
  0x2e   : > { %p78_p13 = por %p77_p2, %p1021_p12  ;;  %s890_s22 = scalar_lea.hbm %s1007_s2, %s542_s25 }
  0x2f   : > { %s150_s26 = scalar_lea.vmem [#allocation6], %s521_s24  ;;  %s147_s4 = scalar_lea.sflag [#allocation7], %s146_s21 }
  0x30   : > { %s158_s27 = sshll.u32 %s150_s26, 4  ;;  %p892_p11 = pnand %p565_p9, %p78_p13  ;;  %s896_s27 = int_to_ptr.vmem [resolvable:$true] %s158_s27 }
  0x31   : > { %s650_s5 = scalar_lea.hbm %s890_s22, 64  ;;  %s655_s8 = scalar_lea.hbm %s1007_s2, 128 }
  0x32   : > { %p651_p0 = scmp.ne.s32.totalorder %s890_s22, %s650_s5  ;;  %p652_p3 = pneg %p892_p11 }
  0x33   : > { %p656_p10 = scmp.lt.u32.totalorder %s890_s22, %s1007_s2  ;;  %p657_p1 = scmp.lt.u32.totalorder %s655_s8, %s650_s5 }
  0x34   : > { %p653_p5 = pnand %p652_p3, %p651_p0  ;;  %p659_p4 = scmp.lt.u32.totalorder %s650_s5, %s890_s22 }
  0x35   : > { %p658_p2 = por %p657_p1, %p656_p10 }
  0x36   : > { %p654_p7 = pneg %p653_p5 }
  0x37   : > { %p660_p6 = por %p659_p4, %p658_p2 }
  0x39   : > { %p661_p9 = pnand %p660_p6, %p654_p7 }
  0x3b   : > { %664 = shalt.err (!%p661_p9)
}
  0x3c   : > { %s665_s21 = scalar_lea.vmem %s896_s27, 64  ;;  %s753_s24 = smov [#allocation6]  }
  0x3d   : > { %p666_p12 = scmp.ne.s32.totalorder %s896_s27, %s665_s21  ;;  %s670_s25 = sshll.u32 %s753_s24, 4  ;;  %s671_s25 = int_to_ptr.vmem [resolvable:$false] %s670_s25 }
  0x3e   : > { %s672_s28 = scalar_lea.vmem %s671_s25, 128  ;;  %p673_p5 = scmp.lt.s32.totalorder %s896_s27, %s671_s25 }
  0x3f   : > { %p668_p13 = pnand %p666_p12, %p652_p3  ;;  %p674_p10 = scmp.lt.s32.totalorder %s672_s28, %s665_s21 }
  0x41   : > { %p669_p0 = pneg %p668_p13  ;;  %p675_p1 = por %p674_p10, %p673_p5 }
  0x43   : > { %p676_p2 = pnand %p675_p1, %p669_p0 }
  0x45   : > { %679 = shalt.err (!%p676_p2)
}
  0x46   : > { %559 = dma.hbm_to_vmem [thread:$0]  (!%p892_p11), %s890_s22, 64, %s896_s27, %s147_s4  }
  0x47   : > { %p1023_p7 = scmp.ne.s32.totalorder %s1014_s20, 0 }
  0x48   : > { %p1024_p3 = scmp.eq.s32.totalorder (!%p1023_p7), %s806_s16, 0 }
  0x49   : > { %167 = sbr.rel (%p1023_p7) target bundleno = 640 (0x280), region = 32 }
  0x50   : > { %725 = dma.done.wait (%p1024_p3), [#allocation4], 64   ;;  %p1025_p4 = pmov %p1024_p3 }
  0x51   : > { %s930_s29 = sand.u32 1, %s742_s13   ;;  %p1026_p6 = scmp.ne.s32.totalorder %s1012_s18, 0 }
  0x52   : > { %727 = vsyncadd (%p1025_p4), [#allocation4], 4294967232  ;;  %s526_s26 = sshll.u32 %s930_s29, 2  ;;  %s174_s30 = scalar_lea.sflag [#allocation7], %s930_s29 }
  0x53   : > { %s177_s5 = scalar_lea.vmem [#allocation6], %s526_s26 }
  0x54   : > { %729 = dma.done.wait (%p1026_p6), %s174_s30, 64  }
  0x55   : > { %731 = vsyncadd (%p1026_p6), %s174_s30, 4294967232  ;;  %v211_v0 = vlaneseq  ;;  %v754_v1 = vmov 1983009808   ;;  %v755_v3 = vmov 0   ;;  %v206_v7 = vld [vmem:[%s177_s5] sm:$0xf] }
  0x56   : > { %v209_v2 = vunpack.c.l.s4 %v754_v1  ;;  %203 = vst [vmem:[#allocation2 + $0x10] sm:$0xff] %v755_v3  ;;  %201 = vst [vmem:[#allocation2] sm:$0xff] %v755_v3  ;;  %372 = vmatprep.mubr.bf16.mxu0 %v755_v3  ;;  %v217_v9 = vcombine.low %v206_v7, %v206_v7  ;;  %s756_s18 = smov 111   ;;  %s757_s20 = smov 126   ;;  %vm241_vm0 = vcmask 1041408   ;;  %vm260_vm1 = vcmask 906244  }
  0x57   : > { %202 = vst [vmem:[#allocation2 + $0x8] sm:$0xff] %v755_v3  ;;  %204 = vst [vmem:[#allocation2 + $0x18] sm:$0xff] %v755_v3  ;;  %v938_v4 = vshrl.u32 %v211_v0, 7  ;;  %s758_s22 = smov 112   ;;  %s759_s27 = smov 127   ;;  %vm242_vm2 = vcmask 1029124  }
  0x58   : > { %205 = vst [vmem:[#allocation2 + $0x20] sm:$0x33] %v755_v3  ;;  %v210_v5 = vunpack.c.0.s8 %v209_v2  ;;  %528 = vst.sshfl [vmem:[#allocation2] sm:$0xf pattern:$0x76325410] %v206_v7 }
  0x59   : > { %s760_s4 = smov 110   ;;  %s761_s6 = smov 96   ;;  %vm257_vm3 = vcmask 908288   ;;  %vm261_vm4 = vmor %vm260_vm1, %vm241_vm0  ;;  %vm238_vm5 = vcmask 1031168   ;;  %vm231_vm7 = vcmask 1043458   ;;  %vm251_vm8 = vcmask 916486  }
  0x5a   : > { %v213_v6 = vsub.s32 %v210_v5, %v938_v4  ;;  %s762_s7 = smov 95   ;;  %s763_s8 = smov 94   ;;  %vm243_vm6 = vmor %vm242_vm2, %vm241_vm0  ;;  %vm232_vm9 = vcmask 1039366   ;;  %vm248_vm10 = vcmask 916480   ;;  %vm228_vm12 = vcmask 1039360  }
  0x5b   : > { %vm252_vm11 = vmor %vm251_vm8, %vm231_vm7  ;;  %vm269_vm14 = vcmask 900102   ;;  %vm278_vm15 = vcmask 783364   ;;  %vm266_vm1 = vcmask 900096   ;;  %vm284_vm8 = vcmask 777216   ;;  %v299_v43 = vld [vmem:[#allocation3] sm:$0xf] }
  0x5c   : > { %v214_v8 = vrot.slane %v206_v7, %v213_v6  ;;  %v224_v10 = vrot.slane %v217_v9, %v213_v6  ;;  %vm233_vm13 = vmor %vm232_vm9, %vm231_vm7  ;;  %v385_v44 = vsub.s32 0, %v938_v4  ;;  %v381_v45 = vld [vmem:[%s1006_s1] sm:$0x3]  ;;  %v389_v46 = vsub.s32 1, %v938_v4  ;;  %s527_s21 = sshll.u32 %s930_s29, 4  ;;  %s543_s24 = sshll.u32 %s806_s16, 8 }
  0x5d   : > { %vm270_vm2 = vmor %vm269_vm14, %vm231_vm7  ;;  %s199_s25 = scalar_lea.vmem [#allocation8], %s527_s21  ;;  %s961_s5 = scalar_lea.hbm %s1008_s3, %s543_s24 }
  0x5e   : > { %254 = vrot.lane.b32.xlu1 %v214_v8, %s756_s18  ;;  %235 = vrot.lane.b32.xlu0 %v214_v8, %s757_s20  ;;  %v386_v47 = vrot.slane %v381_v45, %v385_v44  ;;  %v390_v48 = vrot.slane %v381_v45, %v389_v46  ;;  %s435_s28 = sshll.u32 %s199_s25, 4  ;;  %s421_s18 = scalar_lea.sflag [#allocation5], %s930_s29  ;;  %s963_s28 = int_to_ptr.vmem [resolvable:$true] %s435_s28 }
  0x5f   : > { %s680_s16 = scalar_lea.vmem %s963_s28, 256  ;;  %s764_s20 = smov [#allocation8]  }
  0x60   : > { %p681_p11 = scmp.ne.s32.totalorder %s963_s28, %s680_s16 }
  0x62   : > { %245 = vrot.lane.b32.xlu1 %v224_v10, %s758_s22  ;;  %225 = vrot.lane.b32.xlu0 %v224_v10, %s759_s27  ;;  %p682_p9 = pnand %p681_p11, %p877_p8  ;;  %s684_s22 = sshll.u32 %s764_s20, 4  ;;  %s685_s22 = int_to_ptr.vmem [resolvable:$false] %s684_s22 }
  0x63   : > { %s686_s27 = scalar_lea.vmem %s685_s22, 512  ;;  %p687_p13 = scmp.lt.s32.totalorder %s963_s28, %s685_s22 }
  0x64   : > { %p683_p12 = pneg %p682_p9  ;;  %p688_p0 = scmp.lt.s32.totalorder %s686_s27, %s680_s16 }
  0x66   : > { %263 = vrot.lane.b32.xlu0 %v224_v10, %s760_s4  ;;  %272 = vrot.lane.b32.xlu1 %v214_v8, %s761_s6  ;;  %p689_p5 = por %p688_p0, %p687_p13 }
  0x68   : > { %p690_p10 = pnand %p689_p5, %p683_p12 }
  0x6a   : > { %281 = vrot.lane.b32.xlu0 %v224_v10, %s762_s7  ;;  %290 = vrot.lane.b32.xlu1 %v214_v8, %s763_s8 }
  0xd0   : > { %v255_v11 = vpop.permute.xlu1 %254  ;;  %v236_v12 = vpop.permute.xlu0 %235 }
  0xd1   : > { %v256_v13 = vrot.slane %v255_v11, 4  ;;  %v237_v14 = vrot.slane %v236_v12, 4 }
  0xd3   : > { %v258_v15 = vsel %vm257_vm3, %v255_v11, %v256_v13  ;;  %v239_v16 = vsel %vm238_vm5, %v236_v12, %v237_v14  ;;  %vm275_vm3 = vcmask 785408   ;;  %vm287_vm5 = vcmask 777222  }
  0xd4   : > { %262 = vst.msk [vmem:[#allocation2 + $0x10] sm:$0x33] %vm261_vm4, %v258_v15  ;;  %v246_v17 = vpop.permute.xlu1 %245  ;;  %v226_v18 = vpop.permute.xlu0 %225  ;;  %vm279_vm4 = vmor %vm278_vm15, %vm241_vm0 }
  0xd5   : > { %244 = vst.msk [vmem:[#allocation2 + $0x8] sm:$0x33] %vm243_vm6, %v239_v16  ;;  %v247_v19 = vrot.slane %v246_v17, 4  ;;  %v227_v20 = vrot.slane %v226_v18, 4  ;;  %vm296_vm6 = vcmask 766980   ;;  %vm288_vm9 = vmor %vm287_vm5, %vm231_vm7  ;;  %vm330_vm7 = vcmask 293888  }
  0xd7   : > { %v249_v21 = vsel %vm248_vm10, %v246_v17, %v247_v19  ;;  %v229_v22 = vsel %vm228_vm12, %v226_v18, %v227_v20  ;;  %vm293_vm10 = vcmask 769024  }
  0xd8   : > { %253 = vst.msk [vmem:[#allocation2 + $0x8] sm:$0xcc] %vm252_vm11, %v249_v21  ;;  %v264_v23 = vpop.permute.xlu0 %263  ;;  %v273_v24 = vpop.permute.xlu1 %272  ;;  %vm297_vm11 = vmor %vm296_vm6, %vm241_vm0 }
  0xd9   : > { %234 = vst.msk [vmem:[#allocation2] sm:$0xcc] %vm233_vm13, %v229_v22  ;;  %v265_v25 = vrot.slane %v264_v23, 4  ;;  %v274_v26 = vrot.slane %v273_v24, 4 }
  0xdb   : > { %v267_v27 = vsel %vm266_vm1, %v264_v23, %v265_v25  ;;  %v276_v28 = vsel %vm275_vm3, %v273_v24, %v274_v26 }
  0xdc   : > { %271 = vst.msk [vmem:[#allocation2 + $0x10] sm:$0xcc] %vm270_vm2, %v267_v27  ;;  %v282_v29 = vpop.permute.xlu0 %281  ;;  %v291_v30 = vpop.permute.xlu1 %290 }
  0xdd   : > { %280 = vst.msk [vmem:[#allocation2 + $0x18] sm:$0x33] %vm279_vm4, %v276_v28  ;;  %v283_v31 = vrot.slane %v282_v29, 4  ;;  %v292_v32 = vrot.slane %v291_v30, 4 }
  0xdf   : > { %v285_v33 = vsel %vm284_vm8, %v282_v29, %v283_v31  ;;  %v294_v34 = vsel %vm293_vm10, %v291_v30, %v292_v32 }
  0xe0   : > { %v612_v35 = vld [vmem:[#allocation2 + $0x4] ss:$8 sps:$4 sm:$0xff]   ;;  %289 = vst.msk [vmem:[#allocation2 + $0x18] sm:$0xcc] %vm288_vm9, %v285_v33  ;;  %v614_v36 = vld [vmem:[#allocation2] ss:$8 sps:$4 sm:$0xff]  }
  0xe1   : > { %298 = vst.msk [vmem:[#allocation2 + $0x20] sm:$0x33] %vm297_vm11, %v294_v34  ;;  %340 = vmatprep.subr.bf16.mxu0 %v612_v35 }
  0xe2   : > { %341 = vmatpush1.bf16.msra.mxu0 %v614_v36 }
  0xe7   : > { %v615_v37 = vld [vmem:[#allocation2 + $0x14] ss:$8 sps:$4 sm:$0xff]   ;;  %v617_v38 = vld [vmem:[#allocation2 + $0x10] ss:$8 sps:$4 sm:$0xff]  }
  0xe8   : > { %v304_v39 = vld [vmem:[#allocation2 + $0x20] sm:$0x33]  ;;  %342 = vmatprep.subr.bf16.mxu0 %v615_v37 }
  0xe9   : > { %v534_v40 = vcombine.high %v304_v39, %v304_v39  ;;  %v533_v41 = vcombine.low %v304_v39, %v304_v39  ;;  %343 = vmatpush1.bf16.msra.mxu0 %v617_v38 }
  0xeb   : > { %535 = vmatprep.subr.msk.bf16.mxu0 %vm241_vm0, %v534_v40  ;;  %v335_v42 = vsel %vm241_vm0, %v533_v41, 0 }
  0xed   : > { %345 = vmatpush1.bf16.msra.mxu0 %v335_v42 }
  0xf0   : > { %536 = vmatmul.mubr.msk.bf16.vlgmr.msra.gmra.mrb[0].mxu0 %vm330_vm7, %v299_v43 }
 0x1c3   : > { %v374_v49 = vpop.f32.mrb[0].mxu0 }
 0x1c4   : > { %v376_v50 = vpop.f32.mrb[1].mxu0  ;;  %v393_v51 = vmul.f32 %v386_v47, %v374_v49 }
 0x1c5   : > { %v378_v52 = vpop.f32.mrb[2].mxu0  ;;  %v394_v53 = vmul.f32 %v390_v48, %v376_v50 }
 0x1c6   : > { %v379_v54 = vpop.f32.mrb[3].mxu0  ;;  %v398_v55 = vmul.f32 %v393_v51, %v374_v49 }
 0x1c7   : > { %v395_v56 = vadd.f32 %v394_v53, %v393_v51  ;;  %v399_v57 = vmul.f32 %v394_v53, %v376_v50 }
 0x1c9   : > { %396 = vadd.xlane.f32.xlu0 %v395_v56  ;;  %v400_v58 = vadd.f32 %v399_v57, %v398_v55 }
 0x1cb   : > { %401 = vadd.xlane.f32.xlu1 %v400_v58 }
 0x256   : > { %v397_v59 = vpop.xlane.xlu0 %396 }
 0x257   : > { %v403_v60 = vmul.f32 0.0051020407, %v397_v59 }
 0x258   : > { %v402_v61 = vpop.xlane.xlu1 %401 }
 0x259   : > { %v404_v62 = vmul.f32 0.0051020407, %v402_v61  ;;  %v405_v63 = vmul.f32 %v403_v60, %v403_v60  ;;  %v408_v3 = vsub.f32 %v374_v49, %v403_v60  ;;  %v409_v4 = vsub.f32 %v376_v50, %v403_v60 }
 0x25b   : > { %v406_v0 = vsub.f32 %v404_v62, %v405_v63 }
 0x25d   : > { %v407_v1 = vmax.f32 %v406_v0, 0.0 }
 0x25f   : > { %v410_v2 = vadd.f32 1e-05, %v407_v1 }
 0x261   : > { %620 = vrsqrt.f32 %v410_v2 }
 0x26b   : > { %v621_v5 = vpop.eup %620 }
 0x26c   : > { %v412_v6 = vmul.f32 %v621_v5, %v408_v3  ;;  %v413_v7 = vmul.f32 %v621_v5, %v409_v4 }
 0x26e   : > { %v414_v8 = vmax.f32 %v412_v6, 0.0  ;;  %v415_v9 = vmax.f32 %v413_v7, 0.0 }
 0x270   : > { %v416_v10 = vmul.f32 %v414_v8, %v386_v47  ;;  %v417_v11 = vmul.f32 %v415_v9, %v390_v48 }
 0x272   : > { %418 = vst [vmem:[%s199_s25] sm:$0xff] %v416_v10  ;;  %419 = vst [vmem:[%s199_s25 + $0x8] sm:$0xff] %v417_v11 }
 0x273   : > { %693 = shalt.err (!%p690_p10)
}
 0x274   : > { %s694_s29 = scalar_lea.hbm %s961_s5, 256  ;;  %s698_s7 = scalar_lea.hbm %s1008_s3, 512 }
 0x275   : > { %p695_p1 = scmp.ne.s32.totalorder %s961_s5, %s694_s29  ;;  %p699_p3 = scmp.lt.u32.totalorder %s961_s5, %s1008_s3 }
 0x276   : > { %p700_p4 = scmp.lt.u32.totalorder %s698_s7, %s694_s29  ;;  %p702_p11 = scmp.lt.u32.totalorder %s694_s29, %s961_s5 }
 0x277   : > { %p696_p2 = pnand %p695_p1, %p877_p8 }
 0x278   : > { %p701_p6 = por %p700_p4, %p699_p3 }
 0x279   : > { %p697_p7 = pneg %p696_p2 }
 0x27a   : > { %p703_p9 = por %p702_p11, %p701_p6 }
 0x27c   : > { %p704_p12 = pnand %p703_p9, %p697_p7 }
 0x27e   : > { %707 = shalt.err (!%p704_p12)
}
 0x27f   : > { %550 = dma.vmem_to_hbm [thread:$0]  (%p877_p8), %s963_s28, 256, %s961_s5, %s421_s18  }
 0x280 PF: > { %s447_s10 = sand.u32 1, %s738_s12   ;;  %p1027_p13 = scmp.ne.s32.totalorder %s1013_s19, 0 }
 0x281   : > { %p1028_p0 = scmp.ge.s32.totalorder %s750_s15, 2  ;;  %s448_s21 = scalar_lea.sflag [#allocation5], %s447_s10 }
 0x283   : > { %p561_p5 = pnand %p1028_p0, %p1027_p13 }
 0x285   : > { %733 = dma.done.wait (!%p561_p5), %s448_s21, 256  }
 0x286   : > { %735 = vsyncadd (!%p561_p5), %s448_s21, 4294967040  ;;  %p17_p10 = scmp.ge.s32.totalorder %s833_s23, 4   ;;  %s1029_s12 = smov %s742_s13 }
 0x287   : > { %s1030_s13 = smov %s746_s14  ;;  %s1031_s14 = smov %s869_s11 }
 0x288   : > { %s1032_s15 = smov %s833_s23  ;;  %19 = sbr.rel (!%p17_p10) target bundleno = 6 (0x6), region = 82 }
 0x28f   :  { %453 = vsyncpa [#allocation4], 1 }
 0x290   :  { %455 = vsyncpa [#allocation4 + $0x1], 1 }
 0x291   :  { %456 = vsyncpa [#allocation7], 1 }
 0x292   :  { %458 = vsyncpa [#allocation7 + $0x1], 1 }
 0x293   :  { %459 = vsyncpa [#allocation5], 1 }
 0x294   :  { %461 = vsyncpa [#allocation5 + $0x1], 1 }

</bundles_post_ra>
